<compile_context>
chip_gen: v7x
topology: tpu7x:2x2x1
jax: 0.10.0
libtpu: 0.0.40
codegen_flags: <defaults>
</compile_context>

<pallas_src>
import functools

import jax
import jax.numpy as jnp
from jax.experimental import pallas as pl
from jax.experimental.pallas import tpu as pltpu


# ---------------------------------------------------------------------------
# Kernel
# ---------------------------------------------------------------------------
def _fusion_mlp_kernel(*refs, fusion_type):
    if fusion_type == 'concat':
        (src_ref, dst_ref, w1s_ref, w1d_ref, b1_ref,
         w2_ref, b2_ref, w3_ref, b3_ref, out_ref) = refs
        # concat([src, dst], dim=1) @ W1  ==  src @ W1[:H] + dst @ W1[H:]
        pre1 = (jnp.dot(src_ref[...], w1s_ref[...],
                        preferred_element_type=jnp.float32)
                + jnp.dot(dst_ref[...], w1d_ref[...],
                          preferred_element_type=jnp.float32)
                + b1_ref[...].astype(jnp.float32))
    else:
        (src_ref, dst_ref, w1_ref, b1_ref,
         w2_ref, b2_ref, w3_ref, b3_ref, out_ref) = refs
        src = src_ref[...]
        dst = dst_ref[...]
        if fusion_type == 'multiply':
            emb = src * dst
        elif fusion_type == 'sum':
            emb = src + dst
        elif fusion_type == 'max':
            emb = jnp.maximum(src, dst)
        elif fusion_type == 'abs_difference':
            emb = jnp.abs(src - dst)
        else:
            raise Exception('Wrong fusion operation!')
        pre1 = (jnp.dot(emb, w1_ref[...], preferred_element_type=jnp.float32)
                + b1_ref[...].astype(jnp.float32))

    # ReLU; Dropout(0.5) is identity in eval mode.
    h1 = jnp.maximum(pre1, 0.0).astype(w2_ref.dtype)
    pre2 = (jnp.dot(h1, w2_ref[...], preferred_element_type=jnp.float32)
            + b2_ref[...].astype(jnp.float32))
    # ReLU; Dropout(0.5) is identity in eval mode.
    h2 = jnp.maximum(pre2, 0.0).astype(w3_ref.dtype)
    score = (jnp.dot(h2, w3_ref[...], preferred_element_type=jnp.float32)
             + b3_ref[...].astype(jnp.float32))
    out_ref[...] = score.astype(out_ref.dtype)


# ---------------------------------------------------------------------------
# Host-side helpers
# ---------------------------------------------------------------------------
def _round_up(x, m):
    return ((x + m - 1) // m) * m


def _pad2d(x, rows, cols):
    r, c = x.shape
    if r == rows and c == cols:
        return x
    return jnp.pad(x, ((0, rows - r), (0, cols - c)))


def init_fusion_map_params(key, fusion_type, hidden_dim, out_dim, dtype=jnp.float32):
    """Deterministic synthetic parameters (shapes match the PyTorch module)."""
    hidden_dim_input = hidden_dim * 2 if fusion_type == 'concat' else hidden_dim
    k1, k2, k3, k4, k5, k6 = jax.random.split(key, 6)
    scale = 0.1
    return {
        'w1': scale * jax.random.normal(k1, (hidden_dim_input, hidden_dim), dtype),
        'b1': scale * jax.random.normal(k2, (1, hidden_dim), dtype),
        'w2': scale * jax.random.normal(k3, (hidden_dim, hidden_dim), dtype),
        'b2': scale * jax.random.normal(k4, (1, hidden_dim), dtype),
        'w3': scale * jax.random.normal(k5, (hidden_dim, out_dim), dtype),
        'b3': scale * jax.random.normal(k6, (1, out_dim), dtype),
    }


def fusion_map_forward(src_emb, dst_emb, params, fusion_type, *, block_rows=None):
    """Pallas implementation of fusion_map.forward (eval mode)."""
    n, hidden_dim = src_emb.shape
    out_dim = params['w3'].shape[1]
    dtype = src_emb.dtype

    # Lane-dense padded feature dims (multiples of 128).
    hp = _round_up(hidden_dim, 128)
    op = _round_up(out_dim, 128)

    # Row tile: multiple of 8 (f32) / 16 (bf16); capped so tiles + f32
    # intermediates stay well inside v7x's 64 MiB VMEM.
    itemsize = jnp.dtype(dtype).itemsize
    row_mult = 8 * max(1, 4 // itemsize)
    if block_rows is None:
        block_rows = min(512, _round_up(n, row_mult))
    block_rows = max(row_mult, _round_up(block_rows, row_mult))

    # Host-side zero padding (exact: zero weight rows / bias cols contribute 0,
    # ReLU(0) = 0, padded output cols are sliced off).
    src_p = _pad2d(src_emb, n, hp)
    dst_p = _pad2d(dst_emb, n, hp)
    b1 = _pad2d(params['b1'], 1, hp)
    w2 = _pad2d(params['w2'], hp, hp)
    b2 = _pad2d(params['b2'], 1, hp)
    w3 = _pad2d(params['w3'], hp, op)
    b3 = _pad2d(params['b3'], 1, op)

    if fusion_type == 'concat':
        w1s = _pad2d(params['w1'][:hidden_dim], hp, hp)   # host-side split of W1
        w1d = _pad2d(params['w1'][hidden_dim:], hp, hp)
        weight_args = (w1s, w1d, b1, w2, b2, w3, b3)
        n_mm1 = 2
    else:
        w1 = _pad2d(params['w1'], hp, hp)
        weight_args = (w1, b1, w2, b2, w3, b3)
        n_mm1 = 1

    kernel = functools.partial(_fusion_mlp_kernel, fusion_type=fusion_type)
    grid = (pl.cdiv(n, block_rows),)

    emb_spec = pl.BlockSpec((block_rows, hp), lambda i: (i, 0))
    full = lambda arr: pl.BlockSpec(arr.shape, lambda i: (0, 0))  # VMEM-resident

    flops = 2 * n * hp * (n_mm1 * hp + hp + op)
    bytes_accessed = (
        (src_p.size + dst_p.size) * itemsize
        + sum(w.size * jnp.dtype(w.dtype).itemsize for w in weight_args)
        + n * op * itemsize)

    out_p = pl.pallas_call(
        kernel,
        out_shape=jax.ShapeDtypeStruct((n, op), dtype),
        grid_spec=pltpu.PrefetchScalarGridSpec(
            num_scalar_prefetch=0,
            grid=grid,
            in_specs=[emb_spec, emb_spec] + [full(w) for w in weight_args],
            out_specs=pl.BlockSpec((block_rows, op), lambda i: (i, 0)),
        ),
        compiler_params=pltpu.CompilerParams(
            dimension_semantics=("parallel",),
            # Above the 16/32 MiB scoped defaults, safely under v7x's 64 MiB.
            vmem_limit_bytes=48 * 1024 * 1024,
        ),
        cost_estimate=pl.CostEstimate(
            flops=flops, transcendentals=0, bytes_accessed=bytes_accessed),
    )(src_p, dst_p, *weight_args)

    return out_p[:, :out_dim]


def fusion_map_reference(src_emb, dst_emb, params, fusion_type):
    """Pure-JAX reference mirroring the PyTorch module in eval mode."""
    if fusion_type == 'concat':
        emb = jnp.concatenate([src_emb, dst_emb], axis=1)
    elif fusion_type == 'multiply':
        emb = src_emb * dst_emb
    elif fusion_type == 'sum':
        emb = src_emb + dst_emb
    elif fusion_type == 'max':
        emb = jnp.maximum(src_emb, dst_emb)
    elif fusion_type == 'abs_difference':
        emb = jnp.abs(src_emb - dst_emb)
    else:
        raise Exception('Wrong fusion operation!')
    h1 = jnp.maximum(emb @ params['w1'] + params['b1'], 0.0)
    h2 = jnp.maximum(h1 @ params['w2'] + params['b2'], 0.0)
    return h2 @ params['w3'] + params['b3']


if __name__ == "__main__":
    N, HIDDEN, OUT = 64, 32, 16
    key = jax.random.PRNGKey(0)
    k_src, k_dst, k_params = jax.random.split(key, 3)
    src_emb = jax.random.normal(k_src, (N, HIDDEN), jnp.float32)
    dst_emb = jax.random.normal(k_dst, (N, HIDDEN), jnp.float32)

    for fusion_type in ('concat', 'multiply', 'sum', 'max', 'abs_difference'):
        params = init_fusion_map_params(k_params, fusion_type, HIDDEN, OUT)
        ref = fusion_map_reference(src_emb, dst_emb, params, fusion_type)

        # Multi-step grid (4 row tiles of 16) exercises the pipelined path.
        out = fusion_map_forward(src_emb, dst_emb, params, fusion_type,
                                 block_rows=16)
        out = jax.block_until_ready(out)
        assert out.shape == (N, OUT)
        assert jnp.allclose(out, ref, atol=1e-4, rtol=1e-4), fusion_type

        # Default tile-size selection path.
        out2 = jax.block_until_ready(
            fusion_map_forward(src_emb, dst_emb, params, fusion_type))
        assert jnp.allclose(out2, ref, atol=1e-4, rtol=1e-4), fusion_type

    print("KERNEL_OK")
</pallas_src>

<mosaic_0001>
module attributes {stable_mosaic.version = 11 : i64} {
  func.func @_fusion_mlp_kernel(%arg0: i32, %arg1: memref<16x128xf32, #tpu.memory_space<vmem>>, %arg2: memref<16x128xf32, #tpu.memory_space<vmem>>, %arg3: memref<128x128xf32, #tpu.memory_space<vmem>>, %arg4: memref<128x128xf32, #tpu.memory_space<vmem>>, %arg5: memref<1x128xf32, #tpu.memory_space<vmem>>, %arg6: memref<128x128xf32, #tpu.memory_space<vmem>>, %arg7: memref<1x128xf32, #tpu.memory_space<vmem>>, %arg8: memref<128x128xf32, #tpu.memory_space<vmem>>, %arg9: memref<1x128xf32, #tpu.memory_space<vmem>>, %arg10: memref<16x128xf32, #tpu.memory_space<vmem>>) attributes {dimension_semantics = [#tpu.dimension_semantics<parallel>], iteration_bounds = array<i64: 4>, scalar_prefetch = 0 : i64, scratch_operands = 0 : i64, tpu.core_type = #tpu.core_type<tc>, window_params = [{transform_indices = @transform_0, window_bounds = array<i64: 16, 128>}, {transform_indices = @transform_1, window_bounds = array<i64: 16, 128>}, {pipeline_mode = #tpu.pipeline_mode<synchronous>, transform_indices = @transform_2, window_bounds = array<i64: 128, 128>}, {pipeline_mode = #tpu.pipeline_mode<synchronous>, transform_indices = @transform_3, window_bounds = array<i64: 128, 128>}, {pipeline_mode = #tpu.pipeline_mode<synchronous>, transform_indices = @transform_4, window_bounds = array<i64: 1, 128>}, {pipeline_mode = #tpu.pipeline_mode<synchronous>, transform_indices = @transform_5, window_bounds = array<i64: 128, 128>}, {pipeline_mode = #tpu.pipeline_mode<synchronous>, transform_indices = @transform_6, window_bounds = array<i64: 1, 128>}, {pipeline_mode = #tpu.pipeline_mode<synchronous>, transform_indices = @transform_7, window_bounds = array<i64: 128, 128>}, {pipeline_mode = #tpu.pipeline_mode<synchronous>, transform_indices = @transform_8, window_bounds = array<i64: 1, 128>}, {transform_indices = @transform_9, window_bounds = array<i64: 16, 128>}]} {
    %c0 = arith.constant 0 : index
    %c0_0 = arith.constant 0 : index
    %0 = vector.load %arg1[%c0, %c0_0] : memref<16x128xf32, #tpu.memory_space<vmem>>, vector<16x128xf32>
    %c0_1 = arith.constant 0 : index
    %c0_2 = arith.constant 0 : index
    %1 = vector.load %arg3[%c0_1, %c0_2] : memref<128x128xf32, #tpu.memory_space<vmem>>, vector<128x128xf32>
    %cst = arith.constant dense<0.000000e+00> : vector<16x128xf32>
    %2 = tpu.matmul %0, %1, %cst {dimension_numbers = #tpu.dot_dimension_numbers<[1], [0], [0], [1], [0, 0, 1, 1], [], []>} : vector<16x128xf32>, vector<128x128xf32>, vector<16x128xf32> -> vector<16x128xf32>
    %c0_3 = arith.constant 0 : index
    %c0_4 = arith.constant 0 : index
    %3 = vector.load %arg2[%c0_3, %c0_4] : memref<16x128xf32, #tpu.memory_space<vmem>>, vector<16x128xf32>
    %c0_5 = arith.constant 0 : index
    %c0_6 = arith.constant 0 : index
    %4 = vector.load %arg4[%c0_5, %c0_6] : memref<128x128xf32, #tpu.memory_space<vmem>>, vector<128x128xf32>
    %cst_7 = arith.constant dense<0.000000e+00> : vector<16x128xf32>
    %5 = tpu.matmul %3, %4, %cst_7 {dimension_numbers = #tpu.dot_dimension_numbers<[1], [0], [0], [1], [0, 0, 1, 1], [], []>} : vector<16x128xf32>, vector<128x128xf32>, vector<16x128xf32> -> vector<16x128xf32>
    %6 = arith.addf %2, %5 : vector<16x128xf32>
    %c0_8 = arith.constant 0 : index
    %c0_9 = arith.constant 0 : index
    %7 = vector.load %arg5[%c0_8, %c0_9] : memref<1x128xf32, #tpu.memory_space<vmem>>, vector<1x128xf32>
    %8 = vector.broadcast %7 : vector<1x128xf32> to vector<16x128xf32>
    %9 = arith.addf %6, %8 : vector<16x128xf32>
    %cst_10 = arith.constant 0.000000e+00 : f32
    %10 = vector.broadcast %cst_10 : f32 to vector<16x128xf32>
    %11 = arith.maximumf %9, %10 : vector<16x128xf32>
    %c0_11 = arith.constant 0 : index
    %c0_12 = arith.constant 0 : index
    %12 = vector.load %arg6[%c0_11, %c0_12] : memref<128x128xf32, #tpu.memory_space<vmem>>, vector<128x128xf32>
    %cst_13 = arith.constant dense<0.000000e+00> : vector<16x128xf32>
    %13 = tpu.matmul %11, %12, %cst_13 {dimension_numbers = #tpu.dot_dimension_numbers<[1], [0], [0], [1], [0, 0, 1, 1], [], []>} : vector<16x128xf32>, vector<128x128xf32>, vector<16x128xf32> -> vector<16x128xf32>
    %c0_14 = arith.constant 0 : index
    %c0_15 = arith.constant 0 : index
    %14 = vector.load %arg7[%c0_14, %c0_15] : memref<1x128xf32, #tpu.memory_space<vmem>>, vector<1x128xf32>
    %15 = vector.broadcast %14 : vector<1x128xf32> to vector<16x128xf32>
    %16 = arith.addf %13, %15 : vector<16x128xf32>
    %cst_16 = arith.constant 0.000000e+00 : f32
    %17 = vector.broadcast %cst_16 : f32 to vector<16x128xf32>
    %18 = arith.maximumf %16, %17 : vector<16x128xf32>
    %c0_17 = arith.constant 0 : index
    %c0_18 = arith.constant 0 : index
    %19 = vector.load %arg8[%c0_17, %c0_18] : memref<128x128xf32, #tpu.memory_space<vmem>>, vector<128x128xf32>
    %cst_19 = arith.constant dense<0.000000e+00> : vector<16x128xf32>
    %20 = tpu.matmul %18, %19, %cst_19 {dimension_numbers = #tpu.dot_dimension_numbers<[1], [0], [0], [1], [0, 0, 1, 1], [], []>} : vector<16x128xf32>, vector<128x128xf32>, vector<16x128xf32> -> vector<16x128xf32>
    %c0_20 = arith.constant 0 : index
    %c0_21 = arith.constant 0 : index
    %21 = vector.load %arg9[%c0_20, %c0_21] : memref<1x128xf32, #tpu.memory_space<vmem>>, vector<1x128xf32>
    %22 = vector.broadcast %21 : vector<1x128xf32> to vector<16x128xf32>
    %23 = arith.addf %20, %22 : vector<16x128xf32>
    %c0_22 = arith.constant 0 : index
    %c0_23 = arith.constant 0 : index
    %24 = vector.load %arg10[%c0_22, %c0_23] : memref<16x128xf32, #tpu.memory_space<vmem>>, vector<16x128xf32>
    tpu.vector_store %arg10[%c0_22, %c0_23], %23 {strides = array<i32>} : memref<16x128xf32, #tpu.memory_space<vmem>>, vector<16x128xf32>,
    return
  }
  func.func @transform_0(%arg0: i32) -> (i32, i32) {
    %c0_i32 = arith.constant 0 : i32
    %c0_i32_0 = arith.constant 0 : i32
    return %arg0, %c0_i32 : i32, i32
  }
  func.func @transform_1(%arg0: i32) -> (i32, i32) {
    %c0_i32 = arith.constant 0 : i32
    %c0_i32_0 = arith.constant 0 : i32
    return %arg0, %c0_i32 : i32, i32
  }
  func.func @transform_2(%arg0: i32) -> (i32, i32) {
    %c0_i32 = arith.constant 0 : i32
    %c0_i32_0 = arith.constant 0 : i32
    %c0_i32_1 = arith.constant 0 : i32
    return %c0_i32, %c0_i32_0 : i32, i32
  }
  func.func @transform_3(%arg0: i32) -> (i32, i32) {
    %c0_i32 = arith.constant 0 : i32
    %c0_i32_0 = arith.constant 0 : i32
    %c0_i32_1 = arith.constant 0 : i32
    return %c0_i32, %c0_i32_0 : i32, i32
  }
  func.func @transform_4(%arg0: i32) -> (i32, i32) {
    %c0_i32 = arith.constant 0 : i32
    %c0_i32_0 = arith.constant 0 : i32
    %c0_i32_1 = arith.constant 0 : i32
    return %c0_i32, %c0_i32_0 : i32, i32
  }
  func.func @transform_5(%arg0: i32) -> (i32, i32) {
    %c0_i32 = arith.constant 0 : i32
    %c0_i32_0 = arith.constant 0 : i32
    %c0_i32_1 = arith.constant 0 : i32
    return %c0_i32, %c0_i32_0 : i32, i32
  }
  func.func @transform_6(%arg0: i32) -> (i32, i32) {
    %c0_i32 = arith.constant 0 : i32
    %c0_i32_0 = arith.constant 0 : i32
    %c0_i32_1 = arith.constant 0 : i32
    return %c0_i32, %c0_i32_0 : i32, i32
  }
  func.func @transform_7(%arg0: i32) -> (i32, i32) {
    %c0_i32 = arith.constant 0 : i32
    %c0_i32_0 = arith.constant 0 : i32
    %c0_i32_1 = arith.constant 0 : i32
    return %c0_i32, %c0_i32_0 : i32, i32
  }
  func.func @transform_8(%arg0: i32) -> (i32, i32) {
    %c0_i32 = arith.constant 0 : i32
    %c0_i32_0 = arith.constant 0 : i32
    %c0_i32_1 = arith.constant 0 : i32
    return %c0_i32, %c0_i32_0 : i32, i32
  }
  func.func @transform_9(%arg0: i32) -> (i32, i32) {
    %c0_i32 = arith.constant 0 : i32
    %c0_i32_0 = arith.constant 0 : i32
    return %arg0, %c0_i32 : i32, i32
  }
}

</mosaic_0001>

<bundles_post_ra>
// kernel: tpu_custom_call.1
= control target key start
LH: loop header
LB: loop body
LE: loop exit
PB: predicated region body
PF: predicated region fallthrough
CT: control target
= control target key end

     0   :  { %s2145_s0 = inlined_call_operand.hbm [shape: f32[64,128], index: 0, kind: input, shape index: {}]   ;;  %s2146_s1 = inlined_call_operand.hbm [shape: f32[64,128], index: 1, kind: input, shape index: {}]   ;;  %s2147_s2 = inlined_call_operand.hbm [shape: f32[128,128], index: 2, kind: input, shape index: {}]   ;;  %s2148_s3 = inlined_call_operand.hbm [shape: f32[128,128], index: 3, kind: input, shape index: {}]   ;;  %s2149_s4 = inlined_call_operand.vmem [shape: f32[1,128], index: 4, kind: input, shape index: {}]   ;;  %s2150_s5 = inlined_call_operand.hbm [shape: f32[128,128], index: 5, kind: input, shape index: {}]   ;;  %s2151_s6 = inlined_call_operand.vmem [shape: f32[1,128], index: 6, kind: input, shape index: {}]   ;;  %s2152_s7 = inlined_call_operand.hbm [shape: f32[128,128], index: 7, kind: input, shape index: {}]   ;;  %s2153_s8 = inlined_call_operand.vmem [shape: f32[1,128], index: 8, kind: input, shape index: {}]   ;;  %s2154_s9 = inlined_call_operand.hbm [shape: f32[64,128], index: 9, kind: output, shape index: {}]  }
   0x1   :  { %2165 = sst [smem:[#allocation22_spill]] %s2145_s0 }
   0x2   :  { %2166 = sst [smem:[#allocation23_spill]] %s2147_s2 }
   0x3   :  { %2167 = sst [smem:[#allocation24_spill]] %s2148_s3 }
   0x4   :  { %2168 = sst [smem:[#allocation25_spill]] %s2154_s9 }
   0x5   :  { %14 = vsyncpa [#allocation3], 0 }
   0x6   :  { %16 = vsyncpa [#allocation3 + $0x1], 0 }
   0x7   :  { %17 = vsyncpa [#allocation6], 0 }
   0x8   :  { %19 = vsyncpa [#allocation6 + $0x1], 0 }
   0x9   :  { %20 = vsyncpa [#allocation9], 0 }
   0xa   :  { %21 = vsyncpa [#allocation12], 0 }
   0xb   :  { %22 = vsyncpa [#allocation4], 0 }
   0xc   :  { %24 = vsyncpa [#allocation4 + $0x1], 0  ;;  %s1784_s30 = smov 0   ;;  %s1786_s10 = smov 0  }
   0xd   :  { %s1788_s11 = smov 0   ;;  %s1790_s12 = smov 0  }
   0xe LB: > { %2169 = sst [smem:[#allocation20_spill]] %s1709_s30  ;;  %s1805_s13 = sadd.s32 4294967295, %s1721_s12   ;;  %s1721_s12 = sphi %s1790_s12, %s2199_s12   ;;  %s1717_s11 = sphi %s1788_s11, %s2198_s11   ;;  %s1713_s10 = sphi %s1786_s10, %s2197_s10   ;;  %s1709_s30 = sphi %s1784_s30, %s2196_s30  }
   0xf   : > { %s997_s14 = sadd.s32 4294967294, %s1721_s12   ;;  %p50_p0 = scmp.ne.s32.totalorder %s1713_s10, %s1709_s30 }
  0x10   : > { %p2155_p1 = scmp.eq.s32.totalorder %s1805_s13, 0  ;;  %p253_p3 = scmp.eq.s32.totalorder %s997_s14, 3 }
  0x11   : > { %p998_p5 = scmp.ge.s32.totalorder %s1721_s12, 1  ;;  %p260_p7 = scmp.lt.s32.totalorder %s1721_s12, 5 }
  0x12   : > { %p1814_p4 = por %p2155_p1, %p50_p0  ;;  %p1819_p6 = por %p253_p3, %p50_p0 }
  0x13   : > { %p1824_p8 = pnand %p998_p5, %p260_p7  ;;  %s1723_s18 = smov [#allocation7]  }
  0x14   : > { %s2170_s15 = scalar_select %p1814_p4, 1, 0 }
  0x15   : > { %s2171_s16 = scalar_select %p1819_p6, 1, 0 }
  0x16   : > { %s2173_s17 = scalar_select %p1824_p8, 1, 0 }
  0x17   : > { %2172 = sst [smem:[#allocation21_spill]] %s2171_s16  ;;  %s272_s19 = sshll.u32 %s1723_s18, 4  ;;  %s1828_s19 = int_to_ptr.vmem [resolvable:$true] %s272_s19 }
  0x18   : > { %p1393_p9 = pneg %p1824_p8  ;;  %s1724_s21 = smov [#allocation8]  }
  0x19   : > { %s285_s22 = sshll.u32 %s1724_s21, 4  ;;  %s1725_s23 = smov [#allocation10]   ;;  %s1838_s22 = int_to_ptr.vmem [resolvable:$true] %s285_s22 }
  0x1a   : > { %p1834_p10 = pnand %p1393_p9, %p2155_p1  ;;  %s1840_s24 = sshll.u32 %s1725_s23, 4  ;;  %s302_s24 = int_to_ptr.vmem [resolvable:$true] %s1840_s24 }
  0x1b   : > { %s2175_s2 = sld [smem:[#allocation23_spill]] }
  0x1c   : > { %p1850_p12 = pneg %p1834_p10 }
  0x21   : > { %s1467_s27 = scalar_lea.hbm %s2175_s2, 2048 }
  0x22   : > { %p1468_p11 = scmp.ne.s32.totalorder %s2175_s2, %s1467_s27  ;;  %p1474_p3 = scmp.lt.u32.totalorder %s1467_s27, %s2175_s2 }
  0x24   : > { %p1470_p13 = pnand %p1850_p12, %p1468_p11 }
  0x26   : > { %p1471_p0 = pneg %p1470_p13 }
  0x28   : > { %p1476_p5 = pnand %p1474_p3, %p1471_p0 }
  0x2a   : > { %1479 = shalt.err (!%p1476_p5)
}
  0x2b   : > { %s1480_s23 = scalar_lea.vmem %s1828_s19, 2048  ;;  %p1488_p2 = scmp.lt.s32.totalorder %s1828_s19, %s1828_s19 }
  0x2c   : > { %p1481_p7 = scmp.ne.s32.totalorder %s1828_s19, %s1480_s23  ;;  %p1489_p6 = scmp.lt.s32.totalorder %s1480_s23, %s1480_s23 }
  0x2e   : > { %p1483_p9 = pnand %p1481_p7, %p1850_p12  ;;  %p1490_p11 = por %p1489_p6, %p1488_p2 }
  0x30   : > { %p1484_p1 = pneg %p1483_p9 }
  0x32   : > { %p1491_p13 = pnand %p1490_p11, %p1484_p1 }
  0x34   : > { %1494 = shalt.err (!%p1491_p13)
}
  0x35   : > { %s2161_s25 = smov 128   ;;  %s2163_s26 = smov 8  }
  0x36   : > { %1396 = dma.hbm_to_vmem [thread:$0]  (!%p1834_p10), %s2175_s2, 2048, %s1828_s19, [#allocation6], %s2161_s25, %s2161_s25, %s2163_s26  }
  0x37   : > { %s2177_s3 = sld [smem:[#allocation24_spill]] }
  0x3d   : > { %s1495_s21 = scalar_lea.hbm %s2177_s3, 2048 }
  0x3e   : > { %p1496_p1 = scmp.ne.s32.totalorder %s2177_s3, %s1495_s21  ;;  %p1502_p0 = scmp.lt.u32.totalorder %s1495_s21, %s2177_s3 }
  0x40   : > { %p1498_p2 = pnand %p1496_p1, %p1850_p12 }
  0x42   : > { %p1499_p6 = pneg %p1498_p2 }
  0x44   : > { %p1504_p3 = pnand %p1502_p0, %p1499_p6 }
  0x46   : > { %1507 = shalt.err (!%p1504_p3)
}
  0x47   : > { %s1508_s19 = scalar_lea.vmem %s1838_s22, 2048  ;;  %p1516_p11 = scmp.lt.s32.totalorder %s1838_s22, %s1838_s22 }
  0x48   : > { %p1509_p5 = scmp.ne.s32.totalorder %s1838_s22, %s1508_s19  ;;  %p1517_p13 = scmp.lt.s32.totalorder %s1508_s19, %s1508_s19 }
  0x4a   : > { %p1511_p7 = pnand %p1509_p5, %p1850_p12  ;;  %p1518_p1 = por %p1517_p13, %p1516_p11 }
  0x4c   : > { %p1512_p9 = pneg %p1511_p7 }
  0x4e   : > { %p1519_p2 = pnand %p1518_p1, %p1512_p9 }
  0x50   : > { %1522 = shalt.err (!%p1519_p2)
}
  0x51   : > { %1399 = dma.hbm_to_vmem [thread:$0]  (!%p1834_p10), %s2177_s3, 2048, %s1838_s22, [#allocation9], %s2161_s25, %s2161_s25, %s2163_s26  }
  0x52   : > { %s1523_s28 = scalar_lea.hbm %s2150_s5, 2048 }
  0x53   : > { %p1524_p6 = scmp.ne.s32.totalorder %s2150_s5, %s1523_s28  ;;  %p1530_p5 = scmp.lt.u32.totalorder %s1523_s28, %s2150_s5 }
  0x55   : > { %p1526_p0 = pnand %p1524_p6, %p1850_p12 }
  0x57   : > { %p1527_p3 = pneg %p1526_p0 }
  0x59   : > { %p1532_p7 = pnand %p1530_p5, %p1527_p3 }
  0x5b   : > { %1535 = shalt.err (!%p1532_p7)
}
  0x5c   : > { %s1536_s19 = scalar_lea.vmem %s302_s24, 2048  ;;  %p1544_p1 = scmp.lt.s32.totalorder %s302_s24, %s302_s24 }
  0x5d   : > { %p1537_p9 = scmp.ne.s32.totalorder %s302_s24, %s1536_s19  ;;  %p1545_p2 = scmp.lt.s32.totalorder %s1536_s19, %s1536_s19 }
  0x5f   : > { %p1539_p11 = pnand %p1537_p9, %p1850_p12  ;;  %p1546_p4 = por %p1545_p2, %p1544_p1 }
  0x61   : > { %p1540_p13 = pneg %p1539_p11 }
  0x63   : > { %p1547_p8 = pnand %p1546_p4, %p1540_p13 }
  0x65   : > { %1550 = shalt.err (!%p1547_p8)
}
  0x66   : > { %1402 = dma.hbm_to_vmem [thread:$0]  (!%p1834_p10), %s2150_s5, 2048, %s302_s24, [#allocation9], %s2161_s25, %s2161_s25, %s2163_s26  }
  0x67   : > { %s1728_s30 = smov [#allocation11]   ;;  %s1551_s29 = scalar_lea.hbm %s2152_s7, 2048 }
  0x68   : > { %s317_s16 = sshll.u32 %s1728_s30, 4  ;;  %p1552_p4 = scmp.ne.s32.totalorder %s2152_s7, %s1551_s29  ;;  %s318_s16 = int_to_ptr.vmem [resolvable:$true] %s317_s16 }
  0x69   : > { %p1558_p0 = scmp.lt.u32.totalorder %s1551_s29, %s2152_s7 }
  0x6a   : > { %p1554_p8 = pnand %p1552_p4, %p1850_p12 }
  0x6c   : > { %p1555_p6 = pneg %p1554_p8 }
  0x6e   : > { %p1560_p3 = pnand %p1558_p0, %p1555_p6 }
  0x70   : > { %1563 = shalt.err (!%p1560_p3)
}
  0x71   : > { %s1564_s24 = scalar_lea.vmem %s318_s16, 2048  ;;  %p1572_p11 = scmp.lt.s32.totalorder %s318_s16, %s318_s16 }
  0x72   : > { %p1565_p5 = scmp.ne.s32.totalorder %s318_s16, %s1564_s24  ;;  %p1573_p13 = scmp.lt.s32.totalorder %s1564_s24, %s1564_s24 }
  0x74   : > { %p1567_p7 = pnand %p1565_p5, %p1850_p12  ;;  %p1574_p1 = por %p1573_p13, %p1572_p11 }
  0x76   : > { %p1568_p9 = pneg %p1567_p7 }
  0x78   : > { %p1575_p2 = pnand %p1574_p1, %p1568_p9 }
  0x7a   : > { %1578 = shalt.err (!%p1575_p2)
}
  0x7b   : > { %1405 = dma.hbm_to_vmem [thread:$0]  (!%p1834_p10), %s2152_s7, 2048, %s318_s16, [#allocation12], %s2161_s25, %s2161_s25, %s2163_s26  }
  0x7c   : > { %s1944_s14 = sadd.s32 1, %s1721_s12   ;;  %s37_s20 = sadd.s32 1, %s1717_s11 }
  0x7d   : > { %s34_s30 = ssub.s32 %s1721_s12, %s1944_s14  ;;  %p44_p12 = scmp.ne.s32.totalorder %s1717_s11, %s1713_s10 }
  0x7e   : > { %p35_p4 = scmp.eq.s32.totalorder %s34_s30, 0  ;;  %p45_p8 = scmp.eq.s32.totalorder %s1721_s12, 0 }
  0x7f   : > { %p2178_p6 = scmp.eq.s32.totalorder %s1805_s13, 3  ;;  %p1421_p3 = scmp.lt.s32.totalorder %s1721_s12, 4 }
  0x80   : > { %s1960_s28 = scalar_select %p35_p4, %s1717_s11, %s37_s20  }
  0x81   : > { %p1954_p0 = por %p2178_p6, %p44_p12  ;;  %p46_p5 = por %p45_p8, %p44_p12 }
  0x82   : > { %s334_s29 = sand.u32 1, %s1717_s11   ;;  %s1026_s16 = sshll.u32 %s1721_s12, 8 }
  0x83   : > { %s1004_s18 = sshll.u32 %s334_s29, 4  ;;  %s2180_s0 = sld [smem:[#allocation22_spill]] }
  0x84   : > { %s338_s24 = scalar_lea.vmem [#allocation2], %s1004_s18  ;;  %p1971_p10 = pnand %p1421_p3, %p46_p5 }
  0x85   : > { %s345_s22 = sshll.u32 %s338_s24, 4  ;;  %s1978_s21 = scalar_lea.hbm %s2146_s1, %s1026_s16  ;;  %s1969_s22 = int_to_ptr.vmem [resolvable:$true] %s345_s22 }
  0x86   : > { %s359_s23 = scalar_lea.vmem [#allocation5], %s1004_s18  ;;  %s1982_s26 = scalar_lea.sflag [#allocation3], %s334_s29 }
  0x87   : > { %s1980_s25 = sshll.u32 %s359_s23, 4  ;;  %p1581_p9 = pneg %p1971_p10  ;;  %s2014_s25 = int_to_ptr.vmem [resolvable:$true] %s1980_s25 }
  0x89   : > { %s1967_s19 = scalar_lea.hbm %s2180_s0, %s1026_s16  ;;  %s1584_s20 = scalar_lea.hbm %s2180_s0, 1024 }
  0x8a   : > { %s1579_s24 = scalar_lea.hbm %s1967_s19, 256  ;;  %p1585_p1 = scmp.lt.u32.totalorder %s1967_s19, %s2180_s0 }
  0x8b   : > { %p1580_p7 = scmp.ne.s32.totalorder %s1967_s19, %s1579_s24  ;;  %p1586_p2 = scmp.lt.u32.totalorder %s1584_s20, %s1579_s24 }
  0x8c   : > { %p1588_p4 = scmp.lt.u32.totalorder %s1579_s24, %s1967_s19 }
  0x8d   : > { %p1582_p11 = pnand %p1581_p9, %p1580_p7  ;;  %p1587_p12 = por %p1586_p2, %p1585_p1 }
  0x8f   : > { %p1583_p13 = pneg %p1582_p11  ;;  %p1589_p8 = por %p1588_p4, %p1587_p12 }
  0x91   : > { %p1590_p6 = pnand %p1589_p8, %p1583_p13 }
  0x93   : > { %1593 = shalt.err (!%p1590_p6)
}
  0x94   : > { %s1594_s29 = scalar_lea.vmem %s1969_s22, 256  ;;  %s1729_s2 = smov [#allocation2]  }
  0x95   : > { %p1595_p3 = scmp.ne.s32.totalorder %s1969_s22, %s1594_s29  ;;  %s1599_s3 = sshll.u32 %s1729_s2, 4  ;;  %s1600_s3 = int_to_ptr.vmem [resolvable:$false] %s1599_s3 }
  0x96   : > { %s1601_s18 = scalar_lea.vmem %s1600_s3, 512  ;;  %p1602_p11 = scmp.lt.s32.totalorder %s1969_s22, %s1600_s3 }
  0x97   : > { %p1597_p5 = pnand %p1595_p3, %p1581_p9  ;;  %p1603_p1 = scmp.lt.s32.totalorder %s1601_s18, %s1594_s29 }
  0x99   : > { %p1598_p7 = pneg %p1597_p5  ;;  %p1604_p2 = por %p1603_p1, %p1602_p11 }
  0x9b   : > { %p1605_p12 = pnand %p1604_p2, %p1598_p7 }
  0x9d   : > { %1608 = shalt.err (!%p1605_p12)
}
  0x9e   : > { %s2182_s23 = smov 8   ;;  %s2183_s24 = smov 128  }
  0x9f   : > { %1409 = dma.hbm_to_vmem [thread:$0]  (!%p1971_p10), %s1967_s19, 256, %s1969_s22, %s1982_s26, %s2183_s24, %s2183_s24, %s2182_s23  }
  0xa0   : > { %s355_s20 = sand.u32 1, %s1721_s12   ;;  %s1609_s16 = scalar_lea.hbm %s1978_s21, 256 }
  0xa1   : > { %s2017_s30 = scalar_lea.sflag [#allocation6], %s355_s20  ;;  %p1610_p13 = scmp.ne.s32.totalorder %s1978_s21, %s1609_s16 }
  0xa2   : > { %s1614_s3 = scalar_lea.hbm %s2146_s1, 1024  ;;  %p1615_p6 = scmp.lt.u32.totalorder %s1978_s21, %s2146_s1 }
  0xa3   : > { %p1612_p4 = pnand %p1610_p13, %p1581_p9  ;;  %p1616_p3 = scmp.lt.u32.totalorder %s1614_s3, %s1609_s16 }
  0xa4   : > { %p1618_p7 = scmp.lt.u32.totalorder %s1609_s16, %s1978_s21 }
  0xa5   : > { %p1613_p8 = pneg %p1612_p4  ;;  %p1617_p5 = por %p1616_p3, %p1615_p6 }
  0xa7   : > { %p1619_p11 = por %p1618_p7, %p1617_p5 }
  0xa9   : > { %p1620_p1 = pnand %p1619_p11, %p1613_p8 }
  0xab   : > { %1623 = shalt.err (!%p1620_p1)
}
  0xac   : > { %s1624_s26 = scalar_lea.vmem %s2014_s25, 256  ;;  %s1730_s19 = smov [#allocation5]  }
  0xad   : > { %p1625_p2 = scmp.ne.s32.totalorder %s2014_s25, %s1624_s26  ;;  %s1629_s22 = sshll.u32 %s1730_s19, 4  ;;  %s1630_s22 = int_to_ptr.vmem [resolvable:$false] %s1629_s22 }
  0xae   : > { %s1631_s0 = scalar_lea.vmem %s1630_s22, 512  ;;  %p1632_p4 = scmp.lt.s32.totalorder %s2014_s25, %s1630_s22 }
  0xaf   : > { %p1627_p12 = pnand %p1625_p2, %p1581_p9  ;;  %p1633_p6 = scmp.lt.s32.totalorder %s1631_s0, %s1624_s26 }
  0xb1   : > { %p1628_p13 = pneg %p1627_p12  ;;  %p1634_p3 = por %p1633_p6, %p1632_p4 }
  0xb3   : > { %p1635_p5 = pnand %p1634_p3, %p1628_p13 }
  0xb5   : > { %1638 = shalt.err (!%p1635_p5)
}
  0xb6   : > { %1412 = dma.hbm_to_vmem [thread:$0]  (!%p1971_p10), %s1978_s21, 256, %s2014_s25, %s2017_s30, %s2183_s24, %s2183_s24, %s2182_s23  }
  0xb7   : > { %p2184_p9 = scmp.ne.s32.totalorder %s2173_s17, 0 }
  0xb8   : > { %s2049_s20 = sand.u32 (!%p2184_p9), 1, %s1713_s10   ;;  %p2185_p8 = scmp.ne.s32.totalorder (!%p2184_p9), %s2170_s15, 0 }
  0xb9   : > { %378 = sbr.rel (%p2184_p9) target bundleno = 939 (0x3ab), region = 56  ;;  %s2052_s16 = sshll.u32 (!%p2184_p9), %s2049_s20, 4 }
  0xba   : > { %s381_s9 = scalar_lea.sflag (!%p2184_p9), [#allocation3], %s2049_s20  ;;  %s384_s29 = scalar_lea.vmem (!%p2184_p9), [#allocation2], %s2052_s16 }
  0xc0   : > { %1684 = dma.done.wait (%p2185_p8), %s381_s9, 256  }
  0xc1   : > { %1686 = vsyncadd (%p2185_p8), %s381_s9, 4294967040  ;;  %s389_s17 = sand.u32 1, %s1805_s13   ;;  %s393_s21 = scalar_lea.vmem [#allocation5], %s2052_s16 }
  0xc2   : > { %s390_s25 = scalar_lea.sflag [#allocation6], %s389_s17 }
  0xc3   : > { %1688 = dma.done.wait (%p2185_p8), %s390_s25, 256  }
  0xc4   : > { %1690 = vsyncadd (%p2185_p8), %s390_s25, 4294967040  ;;  %p2186_p10 = scmp.eq.s32.totalorder %s1805_s13, 0 }
  0xc6   : > { %1692 = dma.done.wait (%p2186_p10), [#allocation6], 2048   ;;  %p2187_p7 = pmov %p2186_p10 }
  0xc8   : > { %1694 = vsyncadd (%p2187_p7), [#allocation6], 4294965248  ;;  %p2188_p11 = pmov %p2187_p7 }
  0xc9   : > { %p2189_p1 = pmov %p2187_p7 }
  0xca   : > { %1696 = dma.done.wait (%p2188_p11), [#allocation9], 4096  }
  0xcb   : > { %1698 = vsyncadd (%p2189_p1), [#allocation9], 4294963200  ;;  %p2190_p2 = pmov %p2189_p1 }
  0xcc   : > { %p2191_p12 = pmov %p2189_p1 }
  0xcd   : > { %1700 = dma.done.wait (%p2190_p2), [#allocation12], 2048  }
  0xce   : > { %1702 = vsyncadd (%p2191_p12), [#allocation12], 4294965248  ;;  %v472_v0 = vld [vmem:[#allocation8] sm:$0xff]  ;;  %v473_v1 = vld [vmem:[#allocation8 + $0x8] sm:$0xff]  ;;  %s448_s2 = scalar_lea.vmem [#allocation13], %s2052_s16  ;;  %s1028_s19 = sshll.u32 %s1805_s13, 8 }
  0xcf   : > { %v474_v2 = vld [vmem:[#allocation8 + $0x10] sm:$0xff]  ;;  %v1241_v3 = vpack.c.bf16 %v473_v1, %v472_v0  ;;  %v475_v4 = vld [vmem:[#allocation8 + $0x18] sm:$0xff]  ;;  %v476_v6 = vld [vmem:[#allocation8 + $0x20] sm:$0xff]  ;;  %s863_s3 = sshll.u32 %s448_s2, 4  ;;  %s2192_s9 = sld [smem:[#allocation25_spill]]  ;;  %s2097_s3 = int_to_ptr.vmem [resolvable:$true] %s863_s3 }
  0xd0   : > { %v1245_v5 = vpack.c.bf16 %v475_v4, %v474_v2  ;;  %v477_v7 = vld [vmem:[#allocation8 + $0x28] sm:$0xff]  ;;  %v470_v9 = vld [vmem:[%s393_s21] sm:$0xff]  ;;  %v479_v11 = vld [vmem:[#allocation8 + $0x38] sm:$0xff]  ;;  %s850_s16 = scalar_lea.sflag [#allocation4], %s2049_s20  ;;  %s1639_s17 = scalar_lea.vmem %s2097_s3, 256 }
  0xd1   : > { %1242 = vmatprep.subr.bf16.mxu0 %v1241_v3  ;;  %v1249_v8 = vpack.c.bf16 %v477_v7, %v476_v6  ;;  %v478_v10 = vld [vmem:[#allocation8 + $0x30] sm:$0xff]  ;;  %1133 = vmatprep.mubr.f32.mxu0 %v470_v9  ;;  %v480_v13 = vld [vmem:[#allocation8 + $0x40] sm:$0xff]  ;;  %v481_v14 = vld [vmem:[#allocation8 + $0x48] sm:$0xff]  ;;  %p1640_p13 = scmp.ne.s32.totalorder %s2097_s3, %s1639_s17  ;;  %s1731_s13 = smov [#allocation13]  }
  0xd2   : > { %1244 = vmatpush3.bf16.msra.mxu0 %v1241_v3  ;;  %v1253_v12 = vpack.c.bf16 %v479_v11, %v478_v10  ;;  %v649_v15 = vld [vmem:[#allocation10] sm:$0xff]  ;;  %v650_v16 = vld [vmem:[#allocation10 + $0x8] sm:$0xff]  ;;  %v651_v17 = vld [vmem:[#allocation10 + $0x10] sm:$0xff]  ;;  %v1257_v18 = vpack.c.bf16 %v481_v14, %v480_v13  ;;  %s1643_s25 = sshll.u32 %s1731_s13, 4  ;;  %s1644_s25 = int_to_ptr.vmem [resolvable:$false] %s1643_s25 }
  0xd3   : > { %1246 = vmatprep.subr.bf16.mxu0 %v1245_v5  ;;  %v482_v19 = vld [vmem:[#allocation8 + $0x50] sm:$0xff]  ;;  %v1305_v20 = vpack.c.bf16 %v650_v16, %v649_v15  ;;  %v652_v21 = vld [vmem:[#allocation10 + $0x18] sm:$0xff]  ;;  %v653_v24 = vld [vmem:[#allocation10 + $0x20] sm:$0xff]  ;;  %p1641_p4 = pnand %p1640_p13, %p1954_p0  ;;  %p1646_p3 = scmp.lt.s32.totalorder %s2097_s3, %s1644_s25 }
  0xd4   : > { %v483_v22 = vld [vmem:[#allocation8 + $0x58] sm:$0xff]  ;;  %v1309_v23 = vpack.c.bf16 %v652_v21, %v651_v17  ;;  %v654_v25 = vld [vmem:[#allocation10 + $0x28] sm:$0xff]  ;;  %v484_v27 = vld [vmem:[#allocation8 + $0x60] sm:$0xff] }
  0xd5   : > { %1306 = vmatprep.subr.bf16.mxu1 %v1305_v20  ;;  %v1261_v26 = vpack.c.bf16 %v483_v22, %v482_v19  ;;  %v1313_v28 = vpack.c.bf16 %v654_v25, %v653_v24  ;;  %v485_v29 = vld [vmem:[#allocation8 + $0x68] sm:$0xff]  ;;  %v655_v30 = vld [vmem:[#allocation10 + $0x30] sm:$0xff]  ;;  %v656_v31 = vld [vmem:[#allocation10 + $0x38] sm:$0xff]  ;;  %p1642_p6 = pneg %p1641_p4 }
  0xd6   : > { %1248 = vmatpush3.bf16.msra.mxu0 %v1245_v5  ;;  %1308 = vmatpush3.bf16.msra.mxu1 %v1305_v20  ;;  %v1265_v32 = vpack.c.bf16 %v485_v29, %v484_v27  ;;  %v486_v33 = vld [vmem:[#allocation8 + $0x70] sm:$0xff]  ;;  %v1317_v34 = vpack.c.bf16 %v656_v31, %v655_v30  ;;  %v487_v35 = vld [vmem:[#allocation8 + $0x78] sm:$0xff]  ;;  %v657_v36 = vld [vmem:[#allocation10 + $0x40] sm:$0xff] }
  0xd7   : > { %1250 = vmatprep.subr.bf16.mxu0 %v1249_v8  ;;  %1310 = vmatprep.subr.bf16.mxu1 %v1309_v23  ;;  %v658_v37 = vld [vmem:[#allocation10 + $0x48] sm:$0xff]  ;;  %v1269_v38 = vpack.c.bf16 %v487_v35, %v486_v33  ;;  %v454_v39 = vld [vmem:[#allocation7] sm:$0xff]  ;;  %v659_v42 = vld [vmem:[#allocation10 + $0x50] sm:$0xff] }
  0xd8   : > { %v1321_v40 = vpack.c.bf16 %v658_v37, %v657_v36  ;;  %v455_v41 = vld [vmem:[#allocation7 + $0x8] sm:$0xff]  ;;  %v660_v43 = vld [vmem:[#allocation10 + $0x58] sm:$0xff]  ;;  %v456_v46 = vld [vmem:[#allocation7 + $0x10] sm:$0xff] }
  0xd9   : > { %v1273_v44 = vpack.c.bf16 %v455_v41, %v454_v39  ;;  %v1325_v45 = vpack.c.bf16 %v660_v43, %v659_v42  ;;  %v457_v47 = vld [vmem:[#allocation7 + $0x18] sm:$0xff]  ;;  %v661_v48 = vld [vmem:[#allocation10 + $0x60] sm:$0xff]  ;;  %v662_v49 = vld [vmem:[#allocation10 + $0x68] sm:$0xff] }
  0xda   : > { %1252 = vmatpush3.bf16.msra.mxu0 %v1249_v8  ;;  %1312 = vmatpush3.bf16.msra.mxu1 %v1309_v23  ;;  %v471_v50 = vld [vmem:[%s393_s21 + $0x8] sm:$0xff]  ;;  %v1277_v51 = vpack.c.bf16 %v457_v47, %v456_v46  ;;  %v452_v52 = vld [vmem:[%s384_s29] sm:$0xff]  ;;  %v1329_v55 = vpack.c.bf16 %v662_v49, %v661_v48  ;;  %s1645_s21 = scalar_lea.vmem %s1644_s25, 512 }
  0xdb   : > { %1254 = vmatprep.subr.bf16.mxu0 %v1253_v12  ;;  %1314 = vmatprep.subr.bf16.mxu1 %v1313_v28  ;;  %v458_v53 = vld [vmem:[#allocation7 + $0x20] sm:$0xff]  ;;  %v459_v54 = vld [vmem:[#allocation7 + $0x28] sm:$0xff]  ;;  %v460_v57 = vld [vmem:[#allocation7 + $0x30] sm:$0xff]  ;;  %p1647_p5 = scmp.lt.s32.totalorder %s1645_s21, %s1639_s17 }
  0xdc   : > { %v1281_v56 = vpack.c.bf16 %v459_v54, %v458_v53  ;;  %v461_v58 = vld [vmem:[#allocation7 + $0x38] sm:$0xff]  ;;  %v462_v60 = vld [vmem:[#allocation7 + $0x40] sm:$0xff]  ;;  %v463_v61 = vld [vmem:[#allocation7 + $0x48] sm:$0xff] }
  0xdd   : > { %v1285_v59 = vpack.c.bf16 %v461_v58, %v460_v57  ;;  %v1289_v62 = vpack.c.bf16 %v463_v61, %v462_v60  ;;  %v464_v63 = vld [vmem:[#allocation7 + $0x50] sm:$0xff]  ;;  %v465_v0 = vld [vmem:[#allocation7 + $0x58] sm:$0xff]  ;;  %v466_v2 = vld [vmem:[#allocation7 + $0x60] sm:$0xff]  ;;  %p1648_p9 = por %p1647_p5, %p1646_p3 }
  0xde   : > { %1256 = vmatpush3.bf16.msra.mxu0 %v1253_v12  ;;  %1316 = vmatpush3.bf16.msra.mxu1 %v1313_v28  ;;  %v1293_v1 = vpack.c.bf16 %v465_v0, %v464_v63  ;;  %v467_v3 = vld [vmem:[#allocation7 + $0x68] sm:$0xff]  ;;  %v468_v5 = vld [vmem:[#allocation7 + $0x70] sm:$0xff]  ;;  %v469_v6 = vld [vmem:[#allocation7 + $0x78] sm:$0xff] }
  0xdf   : > { %1258 = vmatprep.subr.bf16.mxu0 %v1257_v18  ;;  %1318 = vmatprep.subr.bf16.mxu1 %v1317_v34  ;;  %v1297_v4 = vpack.c.bf16 %v467_v3, %v466_v2  ;;  %v1301_v7 = vpack.c.bf16 %v469_v6, %v468_v5  ;;  %v453_v8 = vld [vmem:[%s384_s29 + $0x8] sm:$0xff]  ;;  %v663_v9 = vld [vmem:[#allocation10 + $0x70] sm:$0xff]  ;;  %v749_v12 = vld [vmem:[#allocation11] sm:$0xff]  ;;  %s2102_s29 = scalar_lea.hbm %s2192_s9, %s1028_s19  ;;  %p1649_p8 = pnand %p1648_p9, %p1642_p6 }
  0xe0   : > { %v664_v10 = vld [vmem:[#allocation10 + $0x78] sm:$0xff]  ;;  %v750_v13 = vld [vmem:[#allocation11 + $0x8] sm:$0xff]  ;;  %v1018_v15 = vld [vmem:[%s2149_s4] ss:$0 sm:$0xff] }
  0xe1   : > { %v1333_v11 = vpack.c.bf16 %v664_v10, %v663_v9  ;;  %v1337_v14 = vpack.c.bf16 %v750_v13, %v749_v12  ;;  %v751_v20 = vld [vmem:[#allocation11 + $0x10] sm:$0xff]  ;;  %v752_v21 = vld [vmem:[#allocation11 + $0x18] sm:$0xff]  ;;  %v753_v25 = vld [vmem:[#allocation11 + $0x20] sm:$0xff] }
  0xe2   : > { %1260 = vmatpush3.bf16.msra.mxu0 %v1257_v18  ;;  %1320 = vmatpush3.bf16.msra.mxu1 %v1317_v34  ;;  %v1341_v24 = vpack.c.bf16 %v752_v21, %v751_v20  ;;  %v755_v28 = vld [vmem:[#allocation11 + $0x30] sm:$0xff]  ;;  %v756_v29 = vld [vmem:[#allocation11 + $0x38] sm:$0xff]  ;;  %v757_v31 = vld [vmem:[#allocation11 + $0x40] sm:$0xff] }
  0xe3   : > { %1262 = vmatprep.subr.bf16.mxu0 %v1261_v26  ;;  %1322 = vmatprep.subr.bf16.mxu1 %v1321_v40  ;;  %v1349_v30 = vpack.c.bf16 %v756_v29, %v755_v28  ;;  %v759_v34 = vld [vmem:[#allocation11 + $0x50] sm:$0xff]  ;;  %v760_v35 = vld [vmem:[#allocation11 + $0x58] sm:$0xff]  ;;  %v761_v37 = vld [vmem:[#allocation11 + $0x60] sm:$0xff] }
  0xe4   : > { %v1357_v36 = vpack.c.bf16 %v760_v35, %v759_v34  ;;  %v764_v41 = vld [vmem:[#allocation11 + $0x78] sm:$0xff]  ;;  %v1019_v43 = vld [vmem:[%s2151_s6] ss:$0 sm:$0xff] }
  0xe6   : > { %1264 = vmatpush3.bf16.msra.mxu0 %v1261_v26  ;;  %1324 = vmatpush3.bf16.msra.mxu1 %v1321_v40  ;;  %v754_v26 = vld [vmem:[#allocation11 + $0x28] sm:$0xff]  ;;  %v763_v40 = vld [vmem:[#allocation11 + $0x70] sm:$0xff] }
  0xe7   : > { %1266 = vmatprep.subr.bf16.mxu0 %v1265_v32  ;;  %1326 = vmatprep.subr.bf16.mxu1 %v1325_v45  ;;  %v1345_v27 = vpack.c.bf16 %v754_v26, %v753_v25  ;;  %v1365_v42 = vpack.c.bf16 %v764_v41, %v763_v40 }
  0xea   : > { %1268 = vmatpush3.bf16.msra.mxu0 %v1265_v32  ;;  %1328 = vmatpush3.bf16.msra.mxu1 %v1325_v45  ;;  %v758_v32 = vld [vmem:[#allocation11 + $0x48] sm:$0xff] }
  0xeb   : > { %1270 = vmatprep.subr.bf16.mxu0 %v1269_v38  ;;  %1330 = vmatprep.subr.bf16.mxu1 %v1329_v55  ;;  %v1353_v33 = vpack.c.bf16 %v758_v32, %v757_v31 }
  0xee   : > { %1272 = vmatpush3.bf16.msra.mxu0 %v1269_v38  ;;  %1332 = vmatpush3.bf16.msra.mxu1 %v1329_v55  ;;  %v762_v38 = vld [vmem:[#allocation11 + $0x68] sm:$0xff] }
  0xef   : > { %1274 = vmatprep.subr.bf16.mxu0 %v1273_v44  ;;  %1334 = vmatprep.subr.bf16.mxu1 %v1333_v11  ;;  %v1361_v39 = vpack.c.bf16 %v762_v38, %v761_v37 }
  0xf1   : > { %1134 = vmatmul.mubr.f32.vlgmr.msra.gmra.mrb[0].mxu0 %v471_v50  ;;  %v1020_v50 = vld [vmem:[%s2153_s8] ss:$0 sm:$0xff] }
  0xf2   : > { %1276 = vmatpush3.bf16.msra.mxu0 %v1273_v44  ;;  %1168 = vmatprep.mubr.f32.mxu0 %v452_v52 }
  0xf3   : > { %1278 = vmatprep.subr.bf16.mxu0 %v1277_v51  ;;  %1336 = vmatpush3.bf16.msra.mxu1 %v1333_v11 }
  0xf4   : > { %1338 = vmatprep.subr.bf16.mxu1 %v1337_v14 }
  0xf6   : > { %1280 = vmatpush3.bf16.msra.mxu0 %v1277_v51 }
  0xf7   : > { %1282 = vmatprep.subr.bf16.mxu0 %v1281_v56 }
  0xfa   : > { %1284 = vmatpush3.bf16.msra.mxu0 %v1281_v56 }
  0xfb   : > { %1286 = vmatprep.subr.bf16.mxu0 %v1285_v59 }
  0xfe   : > { %1288 = vmatpush3.bf16.msra.mxu0 %v1285_v59 }
  0xff   : > { %1290 = vmatprep.subr.bf16.mxu0 %v1289_v62 }
 0x102   : > { %1292 = vmatpush3.bf16.msra.mxu0 %v1289_v62 }
 0x103   : > { %1294 = vmatprep.subr.bf16.mxu0 %v1293_v1 }
 0x106   : > { %1296 = vmatpush3.bf16.msra.mxu0 %v1293_v1 }
 0x107   : > { %1298 = vmatprep.subr.bf16.mxu0 %v1297_v4 }
 0x10a   : > { %1300 = vmatpush3.bf16.msra.mxu0 %v1297_v4 }
 0x10b   : > { %1302 = vmatprep.subr.bf16.mxu0 %v1301_v7 }
 0x10e   : > { %1304 = vmatpush3.bf16.msra.mxu0 %v1301_v7 }
 0x111   : > { %1169 = vmatmul.mubr.f32.vlgmr.msra.gmra.mrb[0].mxu0 %v453_v8 }
 0x1e4   : > { %v1170_v16 = vpop.f32.mrb[0].mxu0 }
 0x1e5   : > { %v646_v17 = vadd.f32 %v1170_v16, %v1018_v15  ;;  %v629_v18 = vpop.f32.mrb[1].mxu0 }
 0x1e6   : > { %v645_v19 = vadd.f32 %v1018_v15, %v629_v18 }
 0x1e7   : > { %v648_v23 = vmax.f32 %v646_v17, 0.0 }
 0x1e8   : > { %v647_v22 = vmax.f32 %v645_v19, 0.0 }
 0x1ea   : > { %1203 = vmatprep.mubr.f32.mxu1 %v647_v22 }
 0x1eb   : > { %1204 = vmatmul.mubr.f32.vlgmr.msra.gmra.mrb[0].mxu1 %v648_v23 }
 0x1ec   : > { %1340 = vmatpush3.bf16.msra.mxu1 %v1337_v14 }
 0x1ed   : > { %1342 = vmatprep.subr.bf16.mxu1 %v1341_v24 }
 0x1f0   : > { %1344 = vmatpush3.bf16.msra.mxu1 %v1341_v24 }
 0x1f1   : > { %1346 = vmatprep.subr.bf16.mxu1 %v1345_v27 }
 0x1f4   : > { %1348 = vmatpush3.bf16.msra.mxu1 %v1345_v27 }
 0x1f5   : > { %1350 = vmatprep.subr.bf16.mxu1 %v1349_v30 }
 0x1f8   : > { %1352 = vmatpush3.bf16.msra.mxu1 %v1349_v30 }
 0x1f9   : > { %1354 = vmatprep.subr.bf16.mxu1 %v1353_v33 }
 0x1fc   : > { %1356 = vmatpush3.bf16.msra.mxu1 %v1353_v33 }
 0x1fd   : > { %1358 = vmatprep.subr.bf16.mxu1 %v1357_v36 }
 0x200   : > { %1360 = vmatpush3.bf16.msra.mxu1 %v1357_v36 }
 0x201   : > { %1362 = vmatprep.subr.bf16.mxu1 %v1361_v39 }
 0x204   : > { %1364 = vmatpush3.bf16.msra.mxu1 %v1361_v39 }
 0x205   : > { %1366 = vmatprep.subr.bf16.mxu1 %v1365_v42 }
 0x208   : > { %1368 = vmatpush3.bf16.msra.mxu1 %v1365_v42 }
 0x2be   : > { %v1205_v44 = vpop.f32.mrb[0].mxu1 }
 0x2bf   : > { %v744_v45 = vadd.f32 %v1205_v44, %v1019_v43  ;;  %v738_v46 = vpop.f32.mrb[1].mxu1 }
 0x2c0   : > { %v739_v47 = vadd.f32 %v1019_v43, %v738_v46 }
 0x2c1   : > { %v748_v49 = vmax.f32 %v744_v45, 0.0 }
 0x2c2   : > { %v747_v48 = vmax.f32 %v739_v47, 0.0 }
 0x2c4   : > { %1238 = vmatprep.mubr.f32.mxu1 %v747_v48 }
 0x2c5   : > { %1239 = vmatmul.mubr.f32.vlgmr.msra.gmra.mrb[2].mxu1 %v748_v49 }
 0x398   : > { %v1240_v51 = vpop.f32.mrb[2].mxu1 }
 0x399   : > { %v844_v52 = vadd.f32 %v1240_v51, %v1020_v50  ;;  %v838_v53 = vpop.f32.mrb[3].mxu1 }
 0x39a   : > { %v839_v54 = vadd.f32 %v1020_v50, %v838_v53 }
 0x39b   : > { %848 = vst [vmem:[%s448_s2 + $0x8] sm:$0xff] %v844_v52 }
 0x39c   : > { %847 = vst [vmem:[%s448_s2] sm:$0xff] %v839_v54 }
 0x39d   : > { %1652 = shalt.err (!%p1649_p8)
}
 0x39e   : > { %s1653_s15 = scalar_lea.hbm %s2102_s29, 256  ;;  %s1657_s30 = scalar_lea.hbm %s2192_s9, 1024 }
 0x39f   : > { %p1654_p10 = scmp.ne.s32.totalorder %s2102_s29, %s1653_s15  ;;  %p1658_p1 = scmp.lt.u32.totalorder %s2102_s29, %s2192_s9 }
 0x3a0   : > { %p1659_p2 = scmp.lt.u32.totalorder %s1657_s30, %s1653_s15  ;;  %p1661_p13 = scmp.lt.u32.totalorder %s1653_s15, %s2102_s29 }
 0x3a1   : > { %p1655_p7 = pnand %p1654_p10, %p1954_p0 }
 0x3a2   : > { %p1660_p12 = por %p1659_p2, %p1658_p1 }
 0x3a3   : > { %p1656_p11 = pneg %p1655_p7 }
 0x3a4   : > { %p1662_p4 = por %p1661_p13, %p1660_p12 }
 0x3a6   : > { %p1663_p6 = pnand %p1662_p4, %p1656_p11 }
 0x3a8   : > { %1666 = shalt.err (!%p1663_p6)
}
 0x3a9   : > { %s1732_s26 = smov 128   ;;  %s1733_s19 = smov 8  }
 0x3aa   : > { %1391 = dma.vmem_to_hbm [thread:$0]  (%p1954_p0), %s2097_s3, 256, %s2102_s29, %s850_s16, %s1732_s26, %s1732_s26, %s1733_s19  }
 0x3ab PF: > { %s2193_s22 = sld [smem:[#allocation20_spill]]  ;;  %s2194_s0 = sld [smem:[#allocation21_spill]] }
 0x3ac   : > { %p1426_p3 = scmp.ge.s32.totalorder %s1721_s12, 2 }
 0x3b1   : > { %s878_s17 = sand.u32 1, %s2193_s22   ;;  %p2195_p5 = scmp.ne.s32.totalorder %s2194_s0, 0 }
 0x3b2   : > { %s879_s13 = scalar_lea.sflag [#allocation4], %s878_s17 }
 0x3b3   : > { %p1414_p9 = pnand %p1426_p3, %p2195_p5 }
 0x3b5   : > { %1704 = dma.done.wait (!%p1414_p9), %s879_s13, 256  }
 0x3b6   : > { %1706 = vsyncadd (!%p1414_p9), %s879_s13, 4294967040  ;;  %p27_p8 = scmp.ge.s32.totalorder %s1944_s14, 6   ;;  %s2196_s30 = smov %s1713_s10 }
 0x3b7   : > { %s2197_s10 = smov %s1717_s11  ;;  %s2198_s11 = smov %s1960_s28 }
 0x3b8   : > { %s2199_s12 = smov %s1944_s14  ;;  %29 = sbr.rel (!%p27_p8) target bundleno = 14 (0xe), region = 130 }
 0x3bf   :  { %884 = vsyncpa [#allocation3], 1 }
 0x3c0   :  { %886 = vsyncpa [#allocation3 + $0x1], 1 }
 0x3c1   :  { %887 = vsyncpa [#allocation6], 1 }
 0x3c2   :  { %889 = vsyncpa [#allocation6 + $0x1], 1 }
 0x3c3   :  { %890 = vsyncpa [#allocation9], 1 }
 0x3c4   :  { %891 = vsyncpa [#allocation12], 1 }
 0x3c5   :  { %892 = vsyncpa [#allocation4], 1 }
 0x3c6   :  { %894 = vsyncpa [#allocation4 + $0x1], 1 }

</bundles_post_ra>
